<compile_context>
chip_gen: v7x
topology: tpu7x:2x2x1
jax: 0.10.0
libtpu: 0.0.40
codegen_flags: <defaults>
</compile_context>

<pallas_src>
import functools

import jax
import jax.numpy as jnp
import numpy as np
from jax.experimental import pallas as pl
from jax.experimental.pallas import tpu as pltpu


# ----------------------------------------------------------------------------
# Kernel 1: ClipLoss core (contrastive CE with hard head selection) + rank loss.
# Outputs a (1,1) scalar = contrastive_loss + rank_loss.
# ----------------------------------------------------------------------------
def _clip_rank_kernel(scale_ref, img_ref, txt_ref, loss_ref):
    H, B, D = img_ref.shape
    scale = scale_ref[0, 0]

    img = img_ref[...]                                   # [H, B, D] native dtype
    txt = txt_ref[...]                                   # [B, D]

    # MXU-native operand dtype (bf16 when inputs arrive as f32); accumulation
    # stays f32 via preferred_element_type.  Scale folded into the small text
    # operand *before* the cast so the fold costs B*D work, not H*B*B.
    mxu_dtype = jnp.bfloat16 if img.dtype == jnp.float32 else img.dtype
    img_m = img.astype(mxu_dtype)                        # [H, B, D]
    txt_s = (txt.astype(jnp.float32) * scale).astype(mxu_dtype)      # [B, D]
    txt_sf = txt_s.astype(jnp.float32)

    # Pass 1: head-selection diagonals via a VPU row-wise dot (no [H,B,B] slab):
    #   diag_bh[i, h] = scale * <img_h_i, txt_i>   (same bf16-rounded operands
    #   as the MXU path, so near-tie selection stays consistent).
    h_iota = jax.lax.broadcasted_iota(jnp.int32, (B, H), 1)
    diag_bh = jnp.zeros((B, H), jnp.float32)
    for h in range(H):                                   # H static & tiny -> unrolled
        d_h = jnp.sum(img_m[h].astype(jnp.float32) * txt_sf, axis=1, keepdims=True)
        diag_bh = diag_bh + jnp.where(h_iota == h, d_h, 0.0)

    # First-max argmax over heads (torch.argmax tie semantics).
    mx = jnp.max(diag_bh, axis=1, keepdims=True)
    idx = jnp.min(jnp.where(diag_bh == mx, h_iota, H), axis=1, keepdims=True)  # [B,1]
    onehot_bh = (h_iota == idx).astype(jnp.float32)       # [B, H]
    onehot_hb = jnp.transpose(onehot_bh)                  # [H, B] (one tiny transpose)

    # Pass 2: per-head logits one head at a time (only one [B,B] slab live),
    # gather selected rows / columns with broadcast multiply-accumulate.
    lpi = jnp.zeros((B, B), jnp.float32)    # lpi[i, j]  = x[idx[i], i, j]
    lptT = jnp.zeros((B, B), jnp.float32)   # lptT[j, i] = x[idx[i], j, i]
    for h in range(H):
        xh = jax.lax.dot_general(img_m[h], txt_s, (((1,), (1,)), ((), ())),
                                 preferred_element_type=jnp.float32)   # [B, B]
        lpi = lpi + onehot_bh[:, h:h + 1] * xh
        lptT = lptT + onehot_hb[h:h + 1, :] * xh
    lpt = lptT.T

    # Bidirectional CE with labels = arange(B); label logit taken from the
    # gathered logits themselves (same numeric path as the logsumexp).
    eye = (jax.lax.broadcasted_iota(jnp.int32, (B, B), 0)
           == jax.lax.broadcasted_iota(jnp.int32, (B, B), 1))
    sum_diag = jnp.sum(jnp.where(eye, lpi, 0.0), keepdims=True)          # (1, 1)
    m_i = jnp.max(lpi, axis=1, keepdims=True)
    lse_i = m_i + jnp.log(jnp.sum(jnp.exp(lpi - m_i), axis=1, keepdims=True))
    m_t = jnp.max(lpt, axis=1, keepdims=True)
    lse_t = m_t + jnp.log(jnp.sum(jnp.exp(lpt - m_t), axis=1, keepdims=True))
    ce_img = (jnp.sum(lse_i, keepdims=True) - sum_diag) / B
    ce_txt = (jnp.sum(lse_t, keepdims=True) - sum_diag) / B
    contrastive = 0.5 * (ce_img + ce_txt)                                # (1, 1)

    # Rank (MoE diversity) loss: mean over batch of head Gram, mean off-diagonal.
    # Kept in f32: HxH output with a long K is negligible MXU work and avoids
    # low-precision wobble around the 0.7 threshold.
    m2 = img.astype(jnp.float32).reshape(H, B * D)
    gram = jax.lax.dot_general(m2, m2, (((1,), (1,)), ((), ())),
                               preferred_element_type=jnp.float32)       # [H, H]
    eyeH = (jax.lax.broadcasted_iota(jnp.int32, (H, H), 0)
            == jax.lax.broadcasted_iota(jnp.int32, (H, H), 1))
    sum_all = jnp.sum(gram, keepdims=True)
    trace = jnp.sum(jnp.where(eyeH, gram, 0.0), keepdims=True)
    mean_nd = (sum_all - trace) / (B * (H * H - H))
    rank = jnp.maximum(mean_nd - 0.7, 0.0)

    loss_ref[...] = contrastive + rank


# ----------------------------------------------------------------------------
# Kernel 2: caption cross-entropy, tiled (rows x vocab) with online logsumexp.
# No wrapper-side padding: edge tiles are handled with an in-kernel vocab mask
# (out-of-bounds output rows are dropped by the masked block write).
# ----------------------------------------------------------------------------
def _caption_ce_kernel(logits_ref, labels_ref, out_ref, m_sc, l_sc, lbl_sc,
                       *, vocab_size, tile_v, pad_id):
    vj = pl.program_id(1)
    nv = pl.num_programs(1)

    @pl.when(vj == 0)
    def _():
        m_sc[...] = jnp.full_like(m_sc, -jnp.inf)
        l_sc[...] = jnp.zeros_like(l_sc)
        lbl_sc[...] = jnp.zeros_like(lbl_sc)

    lg = logits_ref[...].astype(jnp.float32)              # [TN, TV]
    lb = labels_ref[...]                                   # [TN, 1] int32

    # Absolute vocab index per lane; mask columns beyond the real vocab (edge
    # tiles of a non-dividing grid contain unspecified values -> set to -inf so
    # they contribute 0 to the softmax and never win the max).
    v_iota = jax.lax.broadcasted_iota(jnp.int32, lg.shape, 1) + vj * tile_v
    lg = jnp.where(v_iota < vocab_size, lg, -jnp.inf)

    # Online logsumexp over the vocab (lane) axis.
    tile_max = jnp.max(lg, axis=1, keepdims=True)
    m_new = jnp.maximum(m_sc[...], tile_max)
    corr = jnp.exp(m_sc[...] - m_new)
    p = jnp.exp(lg - m_new)
    l_sc[...] = corr * l_sc[...] + jnp.sum(p, axis=1, keepdims=True)
    m_sc[...] = m_new

    # Logit at the label position if it falls inside this vocab tile.
    lbl_sc[...] += jnp.sum(jnp.where(v_iota == lb, lg, 0.0), axis=1, keepdims=True)

    @pl.when(vj == nv - 1)
    def _():
        lse = m_sc[...] + jnp.log(l_sc[...])               # [TN, 1]
        # NOTE: the (TN,1) column store fires only once per row tile (~1 KiB per
        # tens of MiB of logits read), so it is kept column-shaped rather than
        # relayouted to a lane-dense row; likewise the three (TN,1) scratch
        # accumulators are a few hundred KiB and not worth folding.
        out_ref[...] = jnp.where(lb != pad_id, lse - lbl_sc[...], 0.0)


def _caption_cross_entropy(logits, labels, *, pad_id, tile_n=256, tile_v=2048):
    Bc, T, V = logits.shape
    N = Bc * T
    lg = logits.reshape(N, V)                 # original dtype; upcast per-tile in-kernel
    lb = labels.astype(jnp.int32).reshape(N, 1)

    count = jnp.sum((lb != pad_id).astype(jnp.float32))
    # NOTE: matches torch semantics (all-padding batch -> 0/0 -> NaN); no guard.

    # Tile sizes respecting the (8, 128) constraint.  No padding of the large
    # logits tensor: grid = cdiv and the kernel masks the edge vocab tile;
    # out-of-bounds rows in the last row tile are dropped on the block write.
    tile_n = max(8, (tile_n // 8) * 8)
    tile_v = max(128, (tile_v // 128) * 128)
    tn = N if N <= tile_n else tile_n
    tv = V if V <= tile_v else tile_v
    grid = (pl.cdiv(N, tn), pl.cdiv(V, tv))

    itemsize = jnp.dtype(lg.dtype).itemsize
    cost = pl.CostEstimate(flops=3 * N * V,
                           transcendentals=N * V,
                           bytes_accessed=N * V * itemsize + 2 * N * 4)

    row_loss = pl.pallas_call(
        functools.partial(_caption_ce_kernel, vocab_size=V, tile_v=tv, pad_id=pad_id),
        out_shape=jax.ShapeDtypeStruct((N, 1), jnp.float32),
        grid_spec=pltpu.PrefetchScalarGridSpec(
            num_scalar_prefetch=0,
            grid=grid,
            in_specs=[pl.BlockSpec((tn, tv), lambda ni, vj: (ni, vj)),
                      pl.BlockSpec((tn, 1), lambda ni, vj: (ni, 0))],
            out_specs=pl.BlockSpec((tn, 1), lambda ni, vj: (ni, 0)),
            scratch_shapes=[pltpu.VMEM((tn, 1), jnp.float32),
                            pltpu.VMEM((tn, 1), jnp.float32),
                            pltpu.VMEM((tn, 1), jnp.float32)]),
        compiler_params=pltpu.CompilerParams(
            dimension_semantics=("parallel", "arbitrary"),
            vmem_limit_bytes=32 * 1024 * 1024),
        cost_estimate=cost,
    )(lg, lb)

    return jnp.sum(row_loss) / count


# ----------------------------------------------------------------------------
# Wrapper: matches PyTorch CoCaLoss.forward(..., output_dict=False)
#          -> (clip_loss, caption_loss)
# ----------------------------------------------------------------------------
def coca_loss(image_features, text_features, logits, labels, logit_scale,
              *, caption_loss_weight=2.0, clip_loss_weight=1.0,
              pad_id=0, moe_head=3, caption_tile_n=256, caption_tile_v=2048):
    D = image_features.shape[-1]

    clip_loss = jnp.float32(0.0)
    if clip_loss_weight:
        # (B*H, D) -> head-major (H, B, D); single small copy, original dtype kept.
        img_hbd = jnp.swapaxes(image_features.reshape(-1, moe_head, D), 0, 1)
        scale = jnp.asarray(logit_scale, jnp.float32).reshape(1, 1)

        clip_core = pl.pallas_call(
            _clip_rank_kernel,
            out_shape=jax.ShapeDtypeStruct((1, 1), jnp.float32),
            in_specs=[pl.BlockSpec(memory_space=pltpu.MemorySpace.SMEM),
                      pl.BlockSpec(memory_space=pltpu.MemorySpace.VMEM),
                      pl.BlockSpec(memory_space=pltpu.MemorySpace.VMEM)],
            out_specs=pl.BlockSpec(memory_space=pltpu.MemorySpace.VMEM),
        )(scale, img_hbd, text_features)
        clip_loss = clip_loss_weight * clip_core[0, 0]

    caption_loss = caption_loss_weight * _caption_cross_entropy(
        logits, labels, pad_id=pad_id, tile_n=caption_tile_n, tile_v=caption_tile_v)

    # TODO(synk): distributed (world_size > 1) gather_features path not implemented
    #             (single-device semantics only).
    # TODO(synk): for very large contrastive batch B (>~1k on v7x), tile
    #             _clip_rank_kernel flash-style over the text axis with online
    #             LSE accumulators; kept single-block here.
    return clip_loss, caption_loss


# ----------------------------------------------------------------------------
# Pure-JAX reference (mirrors the PyTorch semantics; contrastive matmuls use the
# same bf16-operand / f32-accumulate contract as the kernel's MXU path).
# ----------------------------------------------------------------------------
def _ref_coca_loss(image_features, text_features, logits, labels, logit_scale,
                   caption_loss_weight, clip_loss_weight, pad_id, moe_head):
    D = image_features.shape[-1]
    img_bhd = image_features.reshape(-1, moe_head, D)
    img_hbd = jnp.swapaxes(img_bhd, 0, 1)                     # [H, B, D]
    B = text_features.shape[0]

    mxu = jnp.bfloat16 if image_features.dtype == jnp.float32 else image_features.dtype
    img_m = img_hbd.astype(mxu).astype(jnp.float32)
    txt_m = (text_features.astype(jnp.float32) * logit_scale).astype(mxu).astype(jnp.float32)
    x = jnp.einsum('hid,jd->hij', img_m, txt_m, precision=jax.lax.Precision.HIGHEST)

    diag = x[:, jnp.arange(B), jnp.arange(B)]                 # [H, B]
    idx = jnp.argmax(diag, axis=0)                            # [B]
    lpi = x[idx, jnp.arange(B), :]                            # [B, B]
    lpt = jnp.swapaxes(x, 1, 2)[idx, jnp.arange(B), :]        # [B, B]

    def ce(l):
        return jnp.mean(jax.nn.logsumexp(l, axis=1) - l[jnp.arange(B), jnp.arange(B)])

    contrastive = 0.5 * (ce(lpi) + ce(lpt))
    sim = jnp.einsum('bhd,bgd->bhg', img_bhd.astype(jnp.float32),
                     img_bhd.astype(jnp.float32),
                     precision=jax.lax.Precision.HIGHEST)
    ms = jnp.mean(sim, axis=0)
    nd = (jnp.sum(ms) - jnp.trace(ms)) / (moe_head * moe_head - moe_head)
    rank = jnp.maximum(nd - 0.7, 0.0)
    clip_loss = clip_loss_weight * (contrastive + rank)

    lg = logits.reshape(-1, logits.shape[-1]).astype(jnp.float32)
    lb = labels.reshape(-1)
    valid = (lb != pad_id).astype(jnp.float32)
    lse = jax.nn.logsumexp(lg, axis=1)
    ll = lg[jnp.arange(lg.shape[0]), lb]
    cap = jnp.sum((lse - ll) * valid) / jnp.sum(valid)
    return clip_loss, caption_loss_weight * cap


if __name__ == "__main__":
    key = jax.random.PRNGKey(0)
    k1, k2, k3, k4 = jax.random.split(key, 4)

    B, H, D = 8, 3, 32          # contrastive batch, moe_head, feature dim
    T, V = 9, 200               # caption seq len, vocab -- deliberately not tile-aligned

    image_features = jax.random.normal(k1, (B * H, D), jnp.float32)
    image_features = image_features / jnp.linalg.norm(image_features, axis=-1, keepdims=True)
    text_features = jax.random.normal(k2, (B, D), jnp.float32)
    text_features = text_features / jnp.linalg.norm(text_features, axis=-1, keepdims=True)
    cap_logits = jax.random.normal(k3, (B, T, V), jnp.float32)
    cap_labels = jax.random.randint(k4, (B, T), 0, V, jnp.int32)
    cap_labels = cap_labels.at[0, 0].set(0)   # ensure the ignore_index path is exercised
    logit_scale = jnp.float32(np.exp(np.log(1.0 / 0.07)))

    caption_loss_weight, clip_loss_weight, pad_id = 2.0, 1.0, 0

    # Small tiles here so the non-dividing grid / edge-mask paths are exercised;
    # production defaults are tile_n=256, tile_v=2048 (4096 fits v6e/v7x budgets).
    clip_l, cap_l = coca_loss(image_features, text_features, cap_logits, cap_labels,
                              logit_scale,
                              caption_loss_weight=caption_loss_weight,
                              clip_loss_weight=clip_loss_weight,
                              pad_id=pad_id, moe_head=H,
                              caption_tile_n=32, caption_tile_v=128)
    clip_l = jax.block_until_ready(clip_l)
    cap_l = jax.block_until_ready(cap_l)

    ref_clip, ref_cap = _ref_coca_loss(image_features, text_features, cap_logits, cap_labels,
                                       logit_scale, caption_loss_weight, clip_loss_weight,
                                       pad_id, H)
    assert np.allclose(np.asarray(clip_l), np.asarray(ref_clip), rtol=1e-3, atol=1e-3), \
        (clip_l, ref_clip)
    assert np.allclose(np.asarray(cap_l), np.asarray(ref_cap), rtol=1e-4, atol=1e-4), \
        (cap_l, ref_cap)

    print("KERNEL_OK")
</pallas_src>

<mosaic_0001>
module attributes {stable_mosaic.version = 11 : i64} {
  func.func @_clip_rank_kernel(%arg0: memref<1x1xf32, #tpu.memory_space<smem>>, %arg1: memref<3x8x32xf32, #tpu.memory_space<vmem>>, %arg2: memref<8x32xf32, #tpu.memory_space<vmem>>, %arg3: memref<1x1xf32, #tpu.memory_space<vmem>>) attributes {dimension_semantics = [], scalar_prefetch = 0 : i64, scratch_operands = 0 : i64, tpu.core_type = #tpu.core_type<tc>} {
    %c0 = arith.constant 0 : index
    %c0_0 = arith.constant 0 : index
    %0 = memref.load %arg0[%c0, %c0_0] : memref<1x1xf32, #tpu.memory_space<smem>>
    %c0_1 = arith.constant 0 : index
    %c0_2 = arith.constant 0 : index
    %c0_3 = arith.constant 0 : index
    %1 = vector.load %arg1[%c0_1, %c0_2, %c0_3] : memref<3x8x32xf32, #tpu.memory_space<vmem>>, vector<3x8x32xf32>
    %c0_4 = arith.constant 0 : index
    %c0_5 = arith.constant 0 : index
    %2 = vector.load %arg2[%c0_4, %c0_5] : memref<8x32xf32, #tpu.memory_space<vmem>>, vector<8x32xf32>
    %3 = arith.truncf %1 : vector<3x8x32xf32> to vector<3x8x32xbf16>
    %4 = vector.broadcast %0 : f32 to vector<8x32xf32>
    %5 = arith.mulf %2, %4 : vector<8x32xf32>
    %6 = arith.truncf %5 : vector<8x32xf32> to vector<8x32xbf16>
    %7 = arith.extf %6 : vector<8x32xbf16> to vector<8x32xf32>
    %8 = tpu.iota {dimensions = array<i32: 1>} : vector<8x3xi32>
    %cst = arith.constant 0.000000e+00 : f32
    %9 = vector.broadcast %cst : f32 to vector<8x3xf32>
    %10 = vector.extract_strided_slice %3 {offsets = [0, 0, 0], sizes = [1, 8, 32], strides = [1, 1, 1]} : vector<3x8x32xbf16> to vector<1x8x32xbf16>
    %11 = vector.shape_cast %10 : vector<1x8x32xbf16> to vector<8x32xbf16>
    %12 = arith.extf %11 : vector<8x32xbf16> to vector<8x32xf32>
    %13 = arith.mulf %12, %7 : vector<8x32xf32>
    %cst_6 = arith.constant dense<0.000000e+00> : vector<8xf32>
    %14 = vector.multi_reduction <add>, %13, %cst_6 [1] : vector<8x32xf32> to vector<8xf32>
    %15 = vector.shape_cast %14 : vector<8xf32> to vector<8x1xf32>
    %c0_i32 = arith.constant 0 : i32
    %16 = vector.broadcast %c0_i32 : i32 to vector<8x3xi32>
    %17 = arith.cmpi eq, %8, %16 : vector<8x3xi32>
    %cst_7 = arith.constant 0.000000e+00 : f32
    %18 = vector.shape_cast %15 : vector<8x1xf32> to vector<8x1xf32>
    %19 = vector.broadcast %18 : vector<8x1xf32> to vector<8x3xf32>
    %20 = vector.broadcast %cst_7 : f32 to vector<8x3xf32>
    %21 = arith.select %17, %19, %20 : vector<8x3xi1>, vector<8x3xf32>
    %22 = arith.addf %9, %21 : vector<8x3xf32>
    %23 = vector.extract_strided_slice %3 {offsets = [1, 0, 0], sizes = [1, 8, 32], strides = [1, 1, 1]} : vector<3x8x32xbf16> to vector<1x8x32xbf16>
    %24 = vector.shape_cast %23 : vector<1x8x32xbf16> to vector<8x32xbf16>
    %25 = arith.extf %24 : vector<8x32xbf16> to vector<8x32xf32>
    %26 = arith.mulf %25, %7 : vector<8x32xf32>
    %cst_8 = arith.constant dense<0.000000e+00> : vector<8xf32>
    %27 = vector.multi_reduction <add>, %26, %cst_8 [1] : vector<8x32xf32> to vector<8xf32>
    %28 = vector.shape_cast %27 : vector<8xf32> to vector<8x1xf32>
    %c1_i32 = arith.constant 1 : i32
    %29 = vector.broadcast %c1_i32 : i32 to vector<8x3xi32>
    %30 = arith.cmpi eq, %8, %29 : vector<8x3xi32>
    %cst_9 = arith.constant 0.000000e+00 : f32
    %31 = vector.shape_cast %28 : vector<8x1xf32> to vector<8x1xf32>
    %32 = vector.broadcast %31 : vector<8x1xf32> to vector<8x3xf32>
    %33 = vector.broadcast %cst_9 : f32 to vector<8x3xf32>
    %34 = arith.select %30, %32, %33 : vector<8x3xi1>, vector<8x3xf32>
    %35 = arith.addf %22, %34 : vector<8x3xf32>
    %36 = vector.extract_strided_slice %3 {offsets = [2, 0, 0], sizes = [1, 8, 32], strides = [1, 1, 1]} : vector<3x8x32xbf16> to vector<1x8x32xbf16>
    %37 = vector.shape_cast %36 : vector<1x8x32xbf16> to vector<8x32xbf16>
    %38 = arith.extf %37 : vector<8x32xbf16> to vector<8x32xf32>
    %39 = arith.mulf %38, %7 : vector<8x32xf32>
    %cst_10 = arith.constant dense<0.000000e+00> : vector<8xf32>
    %40 = vector.multi_reduction <add>, %39, %cst_10 [1] : vector<8x32xf32> to vector<8xf32>
    %41 = vector.shape_cast %40 : vector<8xf32> to vector<8x1xf32>
    %c2_i32 = arith.constant 2 : i32
    %42 = vector.broadcast %c2_i32 : i32 to vector<8x3xi32>
    %43 = arith.cmpi eq, %8, %42 : vector<8x3xi32>
    %cst_11 = arith.constant 0.000000e+00 : f32
    %44 = vector.shape_cast %41 : vector<8x1xf32> to vector<8x1xf32>
    %45 = vector.broadcast %44 : vector<8x1xf32> to vector<8x3xf32>
    %46 = vector.broadcast %cst_11 : f32 to vector<8x3xf32>
    %47 = arith.select %43, %45, %46 : vector<8x3xi1>, vector<8x3xf32>
    %48 = arith.addf %35, %47 : vector<8x3xf32>
    %cst_12 = arith.constant dense<0xFF800000> : vector<8xf32>
    %49 = vector.multi_reduction <maximumf>, %48, %cst_12 [1] : vector<8x3xf32> to vector<8xf32>
    %50 = vector.shape_cast %49 : vector<8xf32> to vector<8x1xf32>
    %51 = vector.broadcast %50 : vector<8x1xf32> to vector<8x3xf32>
    %52 = arith.cmpf oeq, %48, %51 : vector<8x3xf32>
    %c3_i32 = arith.constant 3 : i32
    %53 = vector.broadcast %c3_i32 : i32 to vector<8x3xi32>
    %54 = arith.select %52, %8, %53 : vector<8x3xi1>, vector<8x3xi32>
    %cst_13 = arith.constant dense<2147483647> : vector<8xi32>
    %55 = vector.multi_reduction <minsi>, %54, %cst_13 [1] : vector<8x3xi32> to vector<8xi32>
    %56 = vector.shape_cast %55 : vector<8xi32> to vector<8x1xi32>
    %57 = vector.broadcast %56 : vector<8x1xi32> to vector<8x3xi32>
    %58 = arith.cmpi eq, %8, %57 : vector<8x3xi32>
    %59 = arith.extui %58 : vector<8x3xi1> to vector<8x3xi32>
    %60 = arith.sitofp %59 : vector<8x3xi32> to vector<8x3xf32>
    %61 = tpu.transpose %60, [1, 0] : vector<8x3xf32> -> vector<3x8xf32>
    %cst_14 = arith.constant 0.000000e+00 : f32
    %62 = vector.broadcast %cst_14 : f32 to vector<8x8xf32>
    %cst_15 = arith.constant 0.000000e+00 : f32
    %63 = vector.broadcast %cst_15 : f32 to vector<8x8xf32>
    %64 = vector.extract_strided_slice %3 {offsets = [0, 0, 0], sizes = [1, 8, 32], strides = [1, 1, 1]} : vector<3x8x32xbf16> to vector<1x8x32xbf16>
    %65 = vector.shape_cast %64 : vector<1x8x32xbf16> to vector<8x32xbf16>
    %cst_16 = arith.constant dense<0.000000e+00> : vector<8x8xf32>
    %66 = tpu.matmul %65, %6, %cst_16 {dimension_numbers = #tpu.dot_dimension_numbers<[1], [1], [0], [0], [0, 0, 1, 0], [], []>} : vector<8x32xbf16>, vector<8x32xbf16>, vector<8x8xf32> -> vector<8x8xf32>
    %67 = vector.extract_strided_slice %60 {offsets = [0, 0], sizes = [8, 1], strides = [1, 1]} : vector<8x3xf32> to vector<8x1xf32>
    %68 = vector.broadcast %67 : vector<8x1xf32> to vector<8x8xf32>
    %69 = arith.mulf %68, %66 : vector<8x8xf32>
    %70 = arith.addf %62, %69 : vector<8x8xf32>
    %71 = vector.extract_strided_slice %61 {offsets = [0, 0], sizes = [1, 8], strides = [1, 1]} : vector<3x8xf32> to vector<1x8xf32>
    %72 = vector.broadcast %71 : vector<1x8xf32> to vector<8x8xf32>
    %73 = arith.mulf %72, %66 : vector<8x8xf32>
    %74 = arith.addf %63, %73 : vector<8x8xf32>
    %75 = vector.extract_strided_slice %3 {offsets = [1, 0, 0], sizes = [1, 8, 32], strides = [1, 1, 1]} : vector<3x8x32xbf16> to vector<1x8x32xbf16>
    %76 = vector.shape_cast %75 : vector<1x8x32xbf16> to vector<8x32xbf16>
    %cst_17 = arith.constant dense<0.000000e+00> : vector<8x8xf32>
    %77 = tpu.matmul %76, %6, %cst_17 {dimension_numbers = #tpu.dot_dimension_numbers<[1], [1], [0], [0], [0, 0, 1, 0], [], []>} : vector<8x32xbf16>, vector<8x32xbf16>, vector<8x8xf32> -> vector<8x8xf32>
    %78 = vector.extract_strided_slice %60 {offsets = [0, 1], sizes = [8, 1], strides = [1, 1]} : vector<8x3xf32> to vector<8x1xf32>
    %79 = vector.broadcast %78 : vector<8x1xf32> to vector<8x8xf32>
    %80 = arith.mulf %79, %77 : vector<8x8xf32>
    %81 = arith.addf %70, %80 : vector<8x8xf32>
    %82 = vector.extract_strided_slice %61 {offsets = [1, 0], sizes = [1, 8], strides = [1, 1]} : vector<3x8xf32> to vector<1x8xf32>
    %83 = vector.broadcast %82 : vector<1x8xf32> to vector<8x8xf32>
    %84 = arith.mulf %83, %77 : vector<8x8xf32>
    %85 = arith.addf %74, %84 : vector<8x8xf32>
    %86 = vector.extract_strided_slice %3 {offsets = [2, 0, 0], sizes = [1, 8, 32], strides = [1, 1, 1]} : vector<3x8x32xbf16> to vector<1x8x32xbf16>
    %87 = vector.shape_cast %86 : vector<1x8x32xbf16> to vector<8x32xbf16>
    %cst_18 = arith.constant dense<0.000000e+00> : vector<8x8xf32>
    %88 = tpu.matmul %87, %6, %cst_18 {dimension_numbers = #tpu.dot_dimension_numbers<[1], [1], [0], [0], [0, 0, 1, 0], [], []>} : vector<8x32xbf16>, vector<8x32xbf16>, vector<8x8xf32> -> vector<8x8xf32>
    %89 = vector.extract_strided_slice %60 {offsets = [0, 2], sizes = [8, 1], strides = [1, 1]} : vector<8x3xf32> to vector<8x1xf32>
    %90 = vector.broadcast %89 : vector<8x1xf32> to vector<8x8xf32>
    %91 = arith.mulf %90, %88 : vector<8x8xf32>
    %92 = arith.addf %81, %91 : vector<8x8xf32>
    %93 = vector.extract_strided_slice %61 {offsets = [2, 0], sizes = [1, 8], strides = [1, 1]} : vector<3x8xf32> to vector<1x8xf32>
    %94 = vector.broadcast %93 : vector<1x8xf32> to vector<8x8xf32>
    %95 = arith.mulf %94, %88 : vector<8x8xf32>
    %96 = arith.addf %85, %95 : vector<8x8xf32>
    %97 = tpu.transpose %96, [1, 0] : vector<8x8xf32> -> vector<8x8xf32>
    %98 = tpu.iota {dimensions = array<i32: 0>} : vector<8x8xi32>
    %99 = tpu.iota {dimensions = array<i32: 1>} : vector<8x8xi32>
    %100 = arith.cmpi eq, %98, %99 : vector<8x8xi32>
    %cst_19 = arith.constant 0.000000e+00 : f32
    %101 = vector.broadcast %cst_19 : f32 to vector<8x8xf32>
    %102 = arith.select %100, %92, %101 : vector<8x8xi1>, vector<8x8xf32>
    %103 = vector.shape_cast %102 : vector<8x8xf32> to vector<1x8x8xf32>
    %cst_20 = arith.constant dense<0.000000e+00> : vector<1xf32>
    %104 = vector.multi_reduction <add>, %103, %cst_20 [1, 2] : vector<1x8x8xf32> to vector<1xf32>
    %105 = vector.shape_cast %104 : vector<1xf32> to vector<1x1x1xf32>
    %106 = vector.extract %105[0, 0, 0] : f32 from vector<1x1x1xf32>
    %107 = vector.broadcast %106 : f32 to vector<1x1xf32>
    %cst_21 = arith.constant dense<0xFF800000> : vector<8xf32>
    %108 = vector.multi_reduction <maximumf>, %92, %cst_21 [1] : vector<8x8xf32> to vector<8xf32>
    %109 = vector.shape_cast %108 : vector<8xf32> to vector<8x1xf32>
    %110 = vector.broadcast %109 : vector<8x1xf32> to vector<8x8xf32>
    %111 = arith.subf %92, %110 : vector<8x8xf32>
    %112 = math.exp %111 : vector<8x8xf32>
    %cst_22 = arith.constant dense<0.000000e+00> : vector<8xf32>
    %113 = vector.multi_reduction <add>, %112, %cst_22 [1] : vector<8x8xf32> to vector<8xf32>
    %114 = vector.shape_cast %113 : vector<8xf32> to vector<8x1xf32>
    %115 = math.log %114 : vector<8x1xf32>
    %116 = arith.addf %109, %115 : vector<8x1xf32>
    %cst_23 = arith.constant dense<0xFF800000> : vector<8xf32>
    %117 = vector.multi_reduction <maximumf>, %97, %cst_23 [1] : vector<8x8xf32> to vector<8xf32>
    %118 = vector.shape_cast %117 : vector<8xf32> to vector<8x1xf32>
    %119 = vector.broadcast %118 : vector<8x1xf32> to vector<8x8xf32>
    %120 = arith.subf %97, %119 : vector<8x8xf32>
    %121 = math.exp %120 : vector<8x8xf32>
    %cst_24 = arith.constant dense<0.000000e+00> : vector<8xf32>
    %122 = vector.multi_reduction <add>, %121, %cst_24 [1] : vector<8x8xf32> to vector<8xf32>
    %123 = vector.shape_cast %122 : vector<8xf32> to vector<8x1xf32>
    %124 = math.log %123 : vector<8x1xf32>
    %125 = arith.addf %118, %124 : vector<8x1xf32>
    %126 = vector.shape_cast %116 : vector<8x1xf32> to vector<1x8x1xf32>
    %cst_25 = arith.constant dense<0.000000e+00> : vector<1xf32>
    %127 = vector.multi_reduction <add>, %126, %cst_25 [1, 2] : vector<1x8x1xf32> to vector<1xf32>
    %128 = vector.shape_cast %127 : vector<1xf32> to vector<1x1x1xf32>
    %129 = vector.extract %128[0, 0, 0] : f32 from vector<1x1x1xf32>
    %130 = vector.broadcast %129 : f32 to vector<1x1xf32>
    %131 = arith.subf %130, %107 : vector<1x1xf32>
    %cst_26 = arith.constant 8.000000e+00 : f32
    %132 = vector.broadcast %cst_26 : f32 to vector<1x1xf32>
    %133 = arith.divf %131, %132 : vector<1x1xf32>
    %134 = vector.shape_cast %125 : vector<8x1xf32> to vector<1x8x1xf32>
    %cst_27 = arith.constant dense<0.000000e+00> : vector<1xf32>
    %135 = vector.multi_reduction <add>, %134, %cst_27 [1, 2] : vector<1x8x1xf32> to vector<1xf32>
    %136 = vector.shape_cast %135 : vector<1xf32> to vector<1x1x1xf32>
    %137 = vector.extract %136[0, 0, 0] : f32 from vector<1x1x1xf32>
    %138 = vector.broadcast %137 : f32 to vector<1x1xf32>
    %139 = arith.subf %138, %107 : vector<1x1xf32>
    %cst_28 = arith.constant 8.000000e+00 : f32
    %140 = vector.broadcast %cst_28 : f32 to vector<1x1xf32>
    %141 = arith.divf %139, %140 : vector<1x1xf32>
    %142 = arith.addf %133, %141 : vector<1x1xf32>
    %cst_29 = arith.constant 5.000000e-01 : f32
    %143 = vector.broadcast %cst_29 : f32 to vector<1x1xf32>
    %144 = arith.mulf %143, %142 : vector<1x1xf32>
    %145 = vector.shape_cast %1 : vector<3x8x32xf32> to vector<3x256xf32>
    %cst_30 = arith.constant dense<0.000000e+00> : vector<3x3xf32>
    %146 = tpu.matmul %145, %145, %cst_30 {dimension_numbers = #tpu.dot_dimension_numbers<[1], [1], [0], [0], [0, 0, 1, 0], [], []>} : vector<3x256xf32>, vector<3x256xf32>, vector<3x3xf32> -> vector<3x3xf32>
    %147 = tpu.iota {dimensions = array<i32: 0>} : vector<3x3xi32>
    %148 = tpu.iota {dimensions = array<i32: 1>} : vector<3x3xi32>
    %149 = arith.cmpi eq, %147, %148 : vector<3x3xi32>
    %150 = vector.shape_cast %146 : vector<3x3xf32> to vector<1x3x3xf32>
    %cst_31 = arith.constant dense<0.000000e+00> : vector<1xf32>
    %151 = vector.multi_reduction <add>, %150, %cst_31 [1, 2] : vector<1x3x3xf32> to vector<1xf32>
    %152 = vector.shape_cast %151 : vector<1xf32> to vector<1x1x1xf32>
    %153 = vector.extract %152[0, 0, 0] : f32 from vector<1x1x1xf32>
    %154 = vector.broadcast %153 : f32 to vector<1x1xf32>
    %cst_32 = arith.constant 0.000000e+00 : f32
    %155 = vector.broadcast %cst_32 : f32 to vector<3x3xf32>
    %156 = arith.select %149, %146, %155 : vector<3x3xi1>, vector<3x3xf32>
    %157 = vector.shape_cast %156 : vector<3x3xf32> to vector<1x3x3xf32>
    %cst_33 = arith.constant dense<0.000000e+00> : vector<1xf32>
    %158 = vector.multi_reduction <add>, %157, %cst_33 [1, 2] : vector<1x3x3xf32> to vector<1xf32>
    %159 = vector.shape_cast %158 : vector<1xf32> to vector<1x1x1xf32>
    %160 = vector.extract %159[0, 0, 0] : f32 from vector<1x1x1xf32>
    %161 = vector.broadcast %160 : f32 to vector<1x1xf32>
    %162 = arith.subf %154, %161 : vector<1x1xf32>
    %cst_34 = arith.constant 4.800000e+01 : f32
    %163 = vector.broadcast %cst_34 : f32 to vector<1x1xf32>
    %164 = arith.divf %162, %163 : vector<1x1xf32>
    %cst_35 = arith.constant 0.699999988 : f32
    %165 = vector.broadcast %cst_35 : f32 to vector<1x1xf32>
    %166 = arith.subf %164, %165 : vector<1x1xf32>
    %cst_36 = arith.constant 0.000000e+00 : f32
    %167 = vector.broadcast %cst_36 : f32 to vector<1x1xf32>
    %168 = arith.maximumf %166, %167 : vector<1x1xf32>
    %169 = arith.addf %144, %168 : vector<1x1xf32>
    %c0_37 = arith.constant 0 : index
    %c0_38 = arith.constant 0 : index
    %170 = vector.load %arg3[%c0_37, %c0_38] : memref<1x1xf32, #tpu.memory_space<vmem>>, vector<1x1xf32>
    tpu.vector_store %arg3[%c0_37, %c0_38], %169 {strides = array<i32>} : memref<1x1xf32, #tpu.memory_space<vmem>>, vector<1x1xf32>,
    return
  }
}

</mosaic_0001>

<bundles_post_ra>
// kernel: tpu_custom_call.1
= control target key start
LH: loop header
LB: loop body
LE: loop exit
PB: predicated region body
PF: predicated region fallthrough
CT: control target
= control target key end

     0   :  { %9 = vsyncpa [#allocation4], 0  ;;  %s935_s0 = inlined_call_operand.<no memory space> [shape: f32[1,1], index: 0, kind: input, shape index: {}]   ;;  %s936_s1 = inlined_call_operand.hbm [shape: f32[3,8,32], index: 1, kind: input, shape index: {}]   ;;  %s937_s2 = inlined_call_operand.hbm [shape: f32[8,32], index: 2, kind: input, shape index: {}]   ;;  %s938_s3 = inlined_call_operand.hbm [shape: f32[1,1], index: 3, kind: output, shape index: {}]  }
   0x1   :  { %10 = vsyncpa [#allocation7], 0 }
   0x2   :  { %11 = vsyncpa [#allocation5], 0  ;;  %s768_s12 = smov [#allocation3]   ;;  %s696_s16 = scalar_lea.hbm %s936_s1, 384 }
   0x3   :  { %s19_s13 = sshll.u32 %s768_s12, 4  ;;  %p697_p0 = scmp.ne.s32.totalorder %s936_s1, %s696_s16  ;;  %s20_s13 = int_to_ptr.vmem [resolvable:$true] %s19_s13 }
   0x4   :  { %p700_p1 = scmp.lt.u32.totalorder %s696_s16, %s936_s1 }
   0x6   :  { %p702_p2 = pnand %p700_p1, %p697_p0 }
   0x8   :  { %705 = shalt.err (!%p702_p2)
}
   0x9   :  { %s706_s21 = scalar_lea.vmem %s20_s13, 384  ;;  %p711_p4 = scmp.lt.s32.totalorder %s20_s13, %s20_s13 }
   0xa   :  { %p707_p3 = scmp.ne.s32.totalorder %s20_s13, %s706_s21  ;;  %p712_p5 = scmp.lt.s32.totalorder %s706_s21, %s706_s21 }
   0xc   :  { %p713_p6 = por %p712_p5, %p711_p4 }
   0xe   :  { %p714_p7 = pnand %p713_p6, %p707_p3 }
  0x10   :  { %717 = shalt.err (!%p714_p7)
}
  0x11   :  { %s769_s22 = smov 128   ;;  %s770_s23 = smov 8  }
  0x12   :  { %25 = dma.hbm_to_vmem [thread:$0]  %s936_s1, 384, %s20_s13, [#allocation4], %s769_s22, %s769_s22, %s770_s23  }
  0x13   :  { %s771_s26 = smov [#allocation6]   ;;  %s718_s30 = scalar_lea.hbm %s937_s2, 128 }
  0x14   :  { %s32_s27 = sshll.u32 %s771_s26, 4  ;;  %p719_p8 = scmp.ne.s32.totalorder %s937_s2, %s718_s30  ;;  %s33_s27 = int_to_ptr.vmem [resolvable:$true] %s32_s27 }
  0x15   :  { %p722_p9 = scmp.lt.u32.totalorder %s718_s30, %s937_s2 }
  0x17   :  { %p724_p10 = pnand %p722_p9, %p719_p8 }
  0x19   :  { %727 = shalt.err (!%p724_p10)
}
  0x1a   :  { %s728_s8 = scalar_lea.vmem %s33_s27, 128  ;;  %p733_p12 = scmp.lt.s32.totalorder %s33_s27, %s33_s27 }
  0x1b   :  { %p729_p11 = scmp.ne.s32.totalorder %s33_s27, %s728_s8  ;;  %p734_p13 = scmp.lt.s32.totalorder %s728_s8, %s728_s8 }
  0x1d   :  { %p735_p0 = por %p734_p13, %p733_p12 }
  0x1f   :  { %p736_p1 = pnand %p735_p0, %p729_p11 }
  0x21   :  { %739 = shalt.err (!%p736_p1)
}
  0x22   :  { %35 = dma.hbm_to_vmem [thread:$0]  %s937_s2, 128, %s33_s27, [#allocation7]  }
  0x23   :  { %762 = dma.done.wait [#allocation4], 384  }
  0x24   :  { %763 = vsyncadd [#allocation4], 4294966912 }
  0x25   :  { %764 = dma.done.wait [#allocation7], 128  }
  0x26   :  { %765 = vsyncadd [#allocation7], 4294967168  ;;  %v772_v0 = vmov 0.0   ;;  %v51_v1 = vstv %s935_s0  ;;  %v832_v2 = vld [vmem:[#allocation3] sm:$0xff]  ;;  %v47_v3 = vld [vmem:[#allocation6] sm:$0xff]  ;;  %vm59_vm0 = vcmask 261120   ;;  %v55_v23 = vlaneseq }
  0x27   :  { %639 = vmatprep.subr.bf16.mxu0 %v772_v0  ;;  %645 = vmatprep.subr.bf16.mxu1 %v772_v0  ;;  %v834_v4 = vld [vmem:[#allocation3 + $0x8] sm:$0xff]  ;;  %v838_v5 = vpack.c.bf16 %v832_v2, %v832_v2  ;;  %v52_v6 = vmul.f32 %v51_v1, %v47_v3  ;;  %v844_v8 = vld [vmem:[#allocation3 + $0x10] sm:$0xff]  ;;  %vm82_vm4 = vcmask 23552   ;;  %vm773_vm6 = vmmov 0   ;;  %s776_s0 = smov 32   ;;  %s777_s2 = smov 96  }
  0x28   :  { %v842_v7 = vpack.c.bf16 %v834_v4, %v834_v4  ;;  %v848_v9 = vpack.c.bf16 %v844_v8, %v844_v8  ;;  %v409_v10 = vcombine.low %v832_v2, %v844_v8  ;;  %v410_v11 = vcombine.high %v832_v2, %v844_v8  ;;  %641 = vmatprep.mubr.msk.bf16.mxu0 %vm773_vm6, %v772_v0  ;;  %v631_v48 = vld.sshfl [vmem:[#allocation3 + $0x8] sm:$0xff pattern:$0x76325410]  ;;  %s779_s12 = smov 64   ;;  %s782_s18 = smov [#allocation8]  }
  0x29   :  { %v53_v12 = vpack.c.bf16 %v52_v6, %v52_v6  ;;  %v57_v13 = vunpack.c.l.bf16 %v838_v5  ;;  %v860_v24 = vand.u32 127, %v55_v23  ;;  %v867_v40 = vshrl.u32 %v55_v23, 7  ;;  %647 = vmatprep.mubr.msk.bf16.mxu1 %vm773_vm6, %v772_v0  ;;  %s617_s19 = sshll.u32 %s782_s18, 4  ;;  %s618_s19 = int_to_ptr.vmem [resolvable:$true] %s617_s19 }
  0x2a   :  { %v66_v14 = vunpack.c.l.bf16 %v842_v7  ;;  %v74_v15 = vunpack.c.l.bf16 %v848_v9  ;;  %v774_v41 = vmov 1983009808   ;;  %v775_v43 = vmov 1934713408   ;;  %s740_s20 = scalar_lea.vmem %s618_s19, 16  ;;  %s744_s21 = scalar_lea.vmem %s618_s19, 32 }
  0x2b   :  { %v54_v16 = vunpack.c.l.bf16 %v53_v12  ;;  %vm63_vm1 = vcmp.eq.s32.totalorder %v860_v24, 0  ;;  %vm71_vm2 = vcmp.eq.s32.totalorder %v860_v24, 1  ;;  %vm79_vm3 = vcmp.eq.s32.totalorder %v860_v24, 2  ;;  %p741_p2 = scmp.ne.s32.totalorder %s618_s19, %s740_s20  ;;  %p745_p3 = scmp.lt.s32.totalorder %s618_s19, %s618_s19 }
  0x2c   :  { %v142_v39 = vsel %vm59_vm0, %v53_v12, 0  ;;  %v412_v42 = vunpack.c.l.s4 %v774_v41  ;;  %v444_v44 = vunpack.c.l.s4 %v775_v43  ;;  %v426_v53 = vcombine.high %v834_v4, %v772_v0  ;;  %p746_p4 = scmp.lt.s32.totalorder %s744_s21, %s740_s20 }
  0x2d   :  { %v58_v17 = vmul.f32 %v57_v13, %v54_v16  ;;  %v67_v18 = vmul.f32 %v66_v14, %v54_v16  ;;  %v75_v19 = vmul.f32 %v74_v15, %v54_v16  ;;  %640 = vmatpush3.bf16.xpose.msra.mxu0 %v142_v39  ;;  %646 = vmatpush3.bf16.xpose.msra.mxu1 %v142_v39  ;;  %v778_v6 = vmov 0  }
  0x2e   :  { %651 = vmatprep.subr.bf16.mxu0 %v772_v0  ;;  %v413_v45 = vunpack.c.0.s8 %v412_v42  ;;  %v445_v46 = vunpack.c.0.s8 %v444_v44  ;;  %682 = vset.pattern.permute.xlu1 %v778_v6  ;;  %vm502_vm9 = vcmask 523264   ;;  %vm504_vm10 = vcmask 785408   ;;  %p747_p5 = por %p746_p4, %p745_p3 }
  0x2f   :  { %v60_v20 = vsel %vm59_vm0, %v58_v17, 0.0  ;;  %v76_v21 = vsel %vm59_vm0, %v75_v19, 0.0  ;;  %v68_v22 = vsel %vm59_vm0, %v67_v18, 0.0  ;;  %v193_v41 = vsub.s32 0, %v867_v40 }
  0x30   :  { %61 = vadd.xlane.f32.xlu0 %v60_v20  ;;  %77 = vadd.xlane.f32.xlu1 %v76_v21  ;;  %v416_v47 = vsub.s32 %v413_v45, %v867_v40  ;;  %v448_v50 = vsub.s32 %v445_v46, %v867_v40  ;;  %v248_v42 = vsub.s32 1, %v867_v40  ;;  %v303_v43 = vsub.s32 2, %v867_v40  ;;  %p748_p6 = pnand %p747_p5, %p741_p2 }
  0x31   :  { %vm343_vm11 = vcmask 64512   ;;  %vm341_vm12 = vcmp.eq.s32.totalorder %v867_v40, %v860_v24  ;;  %vm579_vm13 = vcmask 18432   ;;  %vm379_vm14 = vcmask 7168  }
  0x32   :  { %v417_v49 = vrot.slane %v409_v10, %v416_v47  ;;  %v424_v54 = vrot.slane %v410_v11, %v416_v47  ;;  %v440_v55 = vrot.slane %v426_v53, %v416_v47  ;;  %vm609_vm15 = vcmask 0  }
  0x34   :  { %69 = vadd.xlane.f32.xlu0 %v68_v22  ;;  %642 = vmatmul.mubr.msk.bf16.vlgmr.msra.gmra.mrb[0].mxu0 %vm59_vm0, %v838_v5  ;;  %v441_v51 = vcombine.low %v417_v49, %v631_v48  ;;  %v457_v56 = vcombine.low %v424_v54, %v440_v55  ;;  %v458_v57 = vcombine.high %v424_v54, %v440_v55 }
  0x35   :  { %652 = vmatpush3.bf16.xpose.msra.mxu0 %v142_v39  ;;  %648 = vmatmul.mubr.msk.bf16.vlgmr.msra.gmra.mrb[0].mxu1 %vm59_vm0, %v842_v7  ;;  %v442_v60 = vcombine.high %v417_v49, %v631_v48 }
  0x36   :  { %653 = vmatprep.mubr.msk.bf16.mxu0 %vm773_vm6, %v772_v0  ;;  %v882_v52 = vrot.slane %v441_v51, %v448_v50  ;;  %v465_v58 = vrot.slane %v457_v56, %v448_v50  ;;  %v472_v59 = vrot.slane %v458_v57, %v448_v50 }
  0x37   :  { %v456_v62 = vrot.slane %v442_v60, %v448_v50 }
  0x38   :  { %v475_v61 = vcombine.high %v465_v58, %v772_v0  ;;  %v476_v63 = vcombine.high %v472_v59, %v772_v0  ;;  %v473_v5 = vcombine.high %v882_v52, %v772_v0 }
  0x39   :  { %v474_v7 = vcombine.high %v456_v62, %v772_v0 }
  0x3c   :  { %654 = vmatmul.mubr.msk.bf16.vlgmr.msra.gmra.mrb[4].mxu0 %vm59_vm0, %v848_v9 }
  0xbd   :  { %v62_v25 = vpop.xlane.xlu0 %61  ;;  %v78_v26 = vpop.xlane.xlu1 %77 }
  0xbe   :  { %v64_v28 = vsel %vm63_vm1, %v62_v25, 0.0  ;;  %v80_v30 = vsel %vm79_vm3, %v78_v26, 0.0 }
  0xc1   :  { %v70_v27 = vpop.xlane.xlu0 %69 }
  0xc2   :  { %v72_v29 = vsel %vm71_vm2, %v70_v27, 0.0 }
  0xc3   :  { %v73_v31 = vadd.f32 %v72_v29, %v64_v28 }
  0xc5   :  { %v81_v32 = vadd.f32 %v80_v30, %v73_v31 }
  0xc7   :  { %v83_v33 = vsel %vm82_vm4, %v81_v32, -inf }
  0xc8   :  { %84 = vmax.xlane.f32.xlu1 %v83_v33  ;;  %v780_v33 = vmov 1  }
 0x107   :  { %v178_v8 = vpop.f32.mrb[0].mxu0 }
 0x108   :  { %v643_v9 = vpop.f32.mrb[1].mxu0  ;;  %v234_v10 = vpop.f32.mrb[0].mxu1 }
 0x109   :  { %v181_v11 = vpop.f32.mrb[2].mxu0  ;;  %v649_v12 = vpop.f32.mrb[1].mxu1 }
 0x10a   :  { %v644_v13 = vpop.f32.mrb[3].mxu0  ;;  %v237_v14 = vpop.f32.mrb[2].mxu1 }
 0x10b   :  { %v650_v15 = vpop.f32.mrb[3].mxu1 }
 0x10f   :  { %v289_v28 = vpop.f32.mrb[4].mxu0 }
 0x110   :  { %v655_v30 = vpop.f32.mrb[5].mxu0 }
 0x155   :  { %v85_v34 = vpop.xlane.xlu1 %84 }
 0x156   :  { %vm86_vm5 = vcmp.eq.f32.partialorder %v81_v32, %v85_v34  ;;  %v292_v32 = vpop.f32.mrb[6].mxu0 }
 0x157   :  { %v87_v35 = vsel %vm86_vm5, %v860_v24, 3  ;;  %v656_v34 = vpop.f32.mrb[7].mxu0 }
 0x158   :  { %v88_v36 = vsel %vm82_vm4, %v87_v35, 2147483647 }
 0x159   :  { %v90_v37 = vshra.s32 %v88_v36, 16  ;;  %v89_v1 = vand.u32 65535, %v88_v36 }
 0x15b   :  { %v92_v38 = vcvt.s32.f32 %v90_v37  ;;  %v91_v4 = vcvt.s32.f32 %v89_v1  ;;  %v781_v37 = vmov 2  }
 0x15d   :  { %93 = vmin.xlane.f32.xlu0 %v92_v38 }
 0x173   :  { %490 = vrot.lane.b32.xlu0 %v475_v61, %s776_s0 }
 0x177   :  { %498 = vrot.lane.b32.xlu0 %v476_v63, %s777_s2 }
 0x1ea   :  { %v94_v3 = vpop.xlane.xlu0 %93 }
 0x1eb   :  { %vm95_vm7 = vcmp.eq.f32.partialorder %v92_v38, %v94_v3  ;;  %v100_v16 = vcvt.f32.s32 %v94_v3 }
 0x1ec   :  { %v96_v2 = vsel %vm95_vm7, %v91_v4, inf }
 0x1ed   :  { %97 = vmin.xlane.f32.xlu1 %v96_v2  ;;  %v101_v18 = vshll.u32 %v100_v16, 16 }
 0x1ee   :  { %v491_v20 = vpop.permute.xlu0 %490 }
 0x1ef   :  { %v506_v25 = vsel %vm59_vm0, %v465_v58, %v491_v20 }
 0x1f2   :  { %v499_v26 = vpop.permute.xlu0 %498 }
 0x1fe   :  { %478 = vrot.lane.b32.xlu1 %v473_v5, %s776_s0 }
 0x202   :  { %494 = vrot.lane.b32.xlu1 %v472_v59, %s779_s12 }
 0x206   :  { %482 = vrot.lane.b32.xlu1 %v456_v62, %s779_s12 }
 0x20a   :  { %486 = vrot.lane.b32.xlu1 %v474_v7, %s777_s2 }
 0x27a   :  { %v98_v17 = vpop.xlane.xlu1 %97 }
 0x27b   :  { %v99_v19 = vcvt.f32.s32 %v98_v17 }
 0x27d   :  { %v102_v21 = vadd.s32 %v101_v18, %v99_v19 }
 0x27e   :  { %v479_v22 = vpop.permute.xlu1 %478 }
 0x27f   :  { %vm103_vm8 = vcmp.eq.s32.totalorder %v860_v24, %v102_v21 }
 0x280   :  { %v627_v23 = vsel %vm103_vm8, 1.0, %v772_v0  ;;  %v501_v0 = vsel %vm59_vm0, %v882_v52, %v479_v22 }
 0x281   :  { %186 = vperm.xlu1 %682, %v627_v23   ;;  %106 = vxpose.xlu0.b32.start.end [1/1] (short) (narrow) %v627_v23, 8 }
 0x282   :  { %v495_v27 = vpop.permute.xlu1 %494 }
 0x283   :  { %v507_v29 = vsel %vm502_vm9, %v506_v25, %v495_v27 }
 0x284   :  { %v508_v31 = vsel %vm504_vm10, %v507_v29, %v499_v26 }
 0x285   :  { %683 = vset.pattern.permute.xlu1 %v780_v33  ;;  %509 = vmatprep.subr.mxu1 %v508_v31 }
 0x286   :  { %241 = vperm.xlu1 %683, %v627_v23   ;;  %573 = vmatprep.mubr.f32.mxu1 %v508_v31  ;;  %v483_v35 = vpop.permute.xlu1 %482 }
 0x287   :  { %v503_v36 = vsel %vm502_vm9, %v501_v0, %v483_v35 }
 0x28a   :  { %684 = vset.pattern.permute.xlu1 %v781_v37  ;;  %v487_v38 = vpop.permute.xlu1 %486 }
 0x28b   :  { %296 = vperm.xlu1 %684, %v627_v23   ;;  %v505_v39 = vsel %vm504_vm10, %v503_v36, %v487_v38 }
 0x28c   :  { %510 = vmatpush1.xpose.msra.mxu1 %v505_v39 }
 0x28f   :  { %574 = vmatmul.mubr.f32.vlgmr.msra.gmra.mrb[4].mxu1 %v505_v39 }
 0x2aa   :  { %685 = vset.pattern.permute.xlu0 %v781_v37 }
 0x300   :  { %v187_v44 = vpop.permute.xlu1 %186 }
 0x301   :  { %v122_v45 = vpop.trf.xlu0  ;;  %v189_v52 = vmul.f32 %v187_v44, %v178_v8 }
 0x302   :  { %v194_v46 = vrot.slane %v122_v45, %v193_v41  ;;  %v249_v47 = vrot.slane %v122_v45, %v248_v42  ;;  %v304_v48 = vrot.slane %v122_v45, %v303_v43 }
 0x304   :  { %v195_v49 = vmul.f32 %v194_v46, %v178_v8  ;;  %v250_v50 = vmul.f32 %v249_v47, %v234_v10  ;;  %v305_v54 = vmul.f32 %v304_v48, %v289_v28 }
 0x305   :  { %v242_v51 = vpop.permute.xlu1 %241 }
 0x306   :  { %v251_v53 = vadd.f32 %v250_v50, %v195_v49  ;;  %v244_v55 = vmul.f32 %v242_v51, %v234_v10 }
 0x308   :  { %v306_v56 = vadd.f32 %v305_v54, %v251_v53  ;;  %v245_v57 = vadd.f32 %v244_v55, %v189_v52 }
 0x30a   :  { %307 = vxpose.xlu1.b32.start.end [1/1] (short) (narrow) %v306_v56, 8  ;;  %v297_v58 = vpop.permute.xlu1 %296 }
 0x30b   :  { %v299_v59 = vmul.f32 %v297_v58, %v289_v28 }
 0x30d   :  { %v300_v60 = vadd.f32 %v299_v59, %v245_v57 }
 0x30f   :  { %v355_v61 = vsel %vm343_vm11, %v300_v60, -inf  ;;  %v342_v16 = vsel %vm341_vm12, %v300_v60, 0.0 }
 0x310   :  { %356 = vmax.xlane.f32.xlu0 %v355_v61  ;;  %v344_v17 = vsel %vm343_vm11, %v342_v16, 0.0 }
 0x362   :  { %v575_v62 = vpop.f32.mrb[4].mxu1 }
 0x363   :  { %v577_v63 = vpop.f32.mrb[5].mxu1  ;;  %v591_v3 = vsel %vm341_vm12, %v575_v62, 0.0  ;;  %v580_v5 = vsel %vm579_vm13, %v575_v62, 0.0 }
 0x364   :  { %v592_v2 = vsel %vm579_vm13, %v591_v3, 0.0 }
 0x38a   :  { %v323_v1 = vpop.trf.xlu1 }
 0x38b   :  { %v367_v4 = vsel %vm343_vm11, %v323_v1, -inf }
 0x38c   :  { %368 = vmax.xlane.f32.xlu1 %v367_v4 }
 0x390   :  { %593 = vadd.xlane.f32.xlu1 %v592_v2 }
 0x39d   :  { %v357_v6 = vpop.xlane.xlu0 %356 }
 0x39e   :  { %v358_v7 = vsub.f32 %v300_v60, %v357_v6 }
 0x3a0   :  { %v359_v8 = vmul.f32 1.442695, %v358_v7 }
 0x3a2   :  { %688 = vpow2.f32 %v359_v8 }
 0x3ac   :  { %v689_v9 = vpop.eup %688 }
 0x3ad   :  { %v361_v10 = vsel %vm343_vm11, %v689_v9, 0.0 }
 0x3ae   :  { %362 = vadd.xlane.f32.xlu0 %v361_v10 }
 0x419   :  { %v369_v11 = vpop.xlane.xlu1 %368 }
 0x41a   :  { %v370_v12 = vsub.f32 %v323_v1, %v369_v11 }
 0x41c   :  { %v371_v13 = vmul.f32 1.442695, %v370_v12 }
 0x41d   :  { %v594_v41 = vpop.xlane.xlu1 %593 }
 0x41e   :  { %690 = vpow2.f32 %v371_v13  ;;  %v595_v42 = vrot.slane %v594_v41, 4 }
 0x420   :  { %v596_v43 = vadd.f32 %v595_v42, %v594_v41 }
 0x422   :  { %v597_v47 = vrot.slane %v596_v43, 2 }
 0x424   :  { %v598_v53 = vadd.f32 %v597_v47, %v596_v43 }
 0x426   :  { %v599_v58 = vrot.slane %v598_v53, 1 }
 0x428   :  { %v691_v14 = vpop.eup %690  ;;  %v600_v61 = vadd.f32 %v599_v58, %v598_v53 }
 0x429   :  { %v373_v15 = vsel %vm343_vm11, %v691_v14, 0.0 }
 0x42a   :  { %374 = vadd.xlane.f32.xlu0 %v373_v15 }
 0x42e   :  { %345 = vadd.xlane.f32.xlu0 %v344_v17 }
 0x43b   :  { %v363_v18 = vpop.xlane.xlu0 %362 }
 0x43c   :  { %692 = vlog2.f32 %v363_v18 }
 0x446   :  { %v693_v19 = vpop.eup %692 }
 0x447   :  { %v365_v20 = vmul.f32 0.6931472, %v693_v19 }
 0x449   :  { %v366_v21 = vadd.f32 %v365_v20, %v357_v6 }
 0x44b   :  { %v380_v22 = vsel %vm379_vm14, %v366_v21, 0.0 }
 0x44c   :  { %381 = vadd.xlane.f32.xlu0 %v380_v22 }
 0x4b7   :  { %v375_v23 = vpop.xlane.xlu0 %374 }
 0x4b8   :  { %694 = vlog2.f32 %v375_v23 }
 0x4bb   :  { %v346_v25 = vpop.xlane.xlu0 %345 }
 0x4bc   :  { %v347_v26 = vrot.slane %v346_v25, 4 }
 0x4be   :  { %v348_v27 = vadd.f32 %v347_v26, %v346_v25 }
 0x4c0   :  { %v349_v28 = vrot.slane %v348_v27, 2 }
 0x4c2   :  { %v695_v24 = vpop.eup %694  ;;  %v350_v40 = vadd.f32 %v349_v28, %v348_v27 }
 0x4c3   :  { %v377_v29 = vmul.f32 0.6931472, %v695_v24 }
 0x4c4   :  { %v351_v30 = vrot.slane %v350_v40, 1 }
 0x4c5   :  { %v378_v31 = vadd.f32 %v377_v29, %v369_v11 }
 0x4c6   :  { %v352_v32 = vadd.f32 %v351_v30, %v350_v40 }
 0x4c7   :  { %v394_v33 = vsel %vm379_vm14, %v378_v31, 0.0 }
 0x4c8   :  { %395 = vadd.xlane.f32.xlu0 %v394_v33  ;;  %657 = vpush %v352_v32 }
 0x4cc   :  { %581 = vadd.xlane.f32.xlu0 %v580_v5 }
 0x4d9   :  { %v382_v0 = vpop.xlane.xlu0 %381 }
 0x4da   :  { %v383_v34 = vrot.slane %v382_v0, 4 }
 0x4dc   :  { %v384_v35 = vadd.f32 %v383_v34, %v382_v0 }
 0x4de   :  { %v385_v36 = vrot.slane %v384_v35, 2 }
 0x4e0   :  { %v386_v37 = vadd.f32 %v385_v36, %v384_v35 }
 0x4e2   :  { %v387_v38 = vrot.slane %v386_v37, 1 }
 0x4e4   :  { %v388_v39 = vadd.f32 %v387_v38, %v386_v37 }
 0x4e6   :  { %659 = vpush %v388_v39 }
 0x4f9   :  { %s658_s13 = spop %657 }
 0x4fa   :  { %v354_v63 = vstv %s658_s13 }
 0x517   :  { %s660_s14 = spop %659 }
 0x518   :  { %v390_v62 = vstv %s660_s14 }
 0x519   :  { %v391_v4 = vsub.f32 %v390_v62, %v354_v63 }
 0x51b   :  { %v393_v7 = vmul.f32 0.125, %v391_v4 }
 0x555   :  { %v396_v44 = vpop.xlane.xlu0 %395 }
 0x556   :  { %v397_v45 = vrot.slane %v396_v44, 4 }
 0x558   :  { %v398_v46 = vadd.f32 %v397_v45, %v396_v44 }
 0x559   :  { %v582_v48 = vpop.xlane.xlu0 %581 }
 0x55a   :  { %v399_v49 = vrot.slane %v398_v46, 2  ;;  %v583_v50 = vrot.slane %v582_v48, 4 }
 0x55c   :  { %v584_v51 = vadd.f32 %v583_v50, %v582_v48  ;;  %v400_v52 = vadd.f32 %v399_v49, %v398_v46 }
 0x55e   :  { %v585_v54 = vrot.slane %v584_v51, 2  ;;  %v401_v55 = vrot.slane %v400_v52, 1 }
 0x560   :  { %v586_v56 = vadd.f32 %v585_v54, %v584_v51  ;;  %v402_v57 = vadd.f32 %v401_v55, %v400_v52 }
 0x562   :  { %661 = vpush %v402_v57  ;;  %v587_v59 = vrot.slane %v586_v56, 1 }
 0x564   :  { %v588_v60 = vadd.f32 %v587_v59, %v586_v56 }
 0x566   :  { %663 = vpush %v588_v60 }
 0x567   :  { %665 = vpush %v600_v61 }
 0x593   :  { %s662_s15 = spop %661 }
 0x594   :  { %v404_v1 = vstv %s662_s15 }
 0x595   :  { %v405_v3 = vsub.f32 %v404_v1, %v354_v63 }
 0x597   :  { %s664_s16 = spop %663  ;;  %v406_v2 = vmul.f32 0.125, %v405_v3 }
 0x598   :  { %v590_v5 = vstv %s664_s16  ;;  %s666_s17 = spop %665 }
 0x599   :  { %v602_v6 = vstv %s666_s17  ;;  %v407_v9 = vadd.f32 %v406_v2, %v393_v7 }
 0x59a   :  { %v603_v8 = vsub.f32 %v590_v5, %v602_v6 }
 0x59b   :  { %v408_v12 = vmul.f32 0.5, %v407_v9 }
 0x59c   :  { %v605_v10 = vmul.f32 0.020833334, %v603_v8 }
 0x59e   :  { %v632_v11 = vadd.f32 -0.7, %v605_v10 }
 0x5a0   :  { %v607_v13 = vmax.f32 %v632_v11, 0.0 }
 0x5a2   :  { %v608_v14 = vadd.f32 %v607_v13, %v408_v12 }
 0x5a4   :  { %610 = vst.msk [vmem:[#allocation8] sm:$0x1] %vm609_vm15, %v608_v14 }
 0x5a5   :  { %751 = shalt.err (!%p748_p6)
}
 0x5a6   :  { %s752_s24 = scalar_lea.hbm %s938_s3, 16 }
 0x5a7   :  { %p753_p7 = scmp.ne.s32.totalorder %s938_s3, %s752_s24  ;;  %p756_p8 = scmp.lt.u32.totalorder %s752_s24, %s938_s3 }
 0x5a9   :  { %p758_p9 = pnand %p756_p8, %p753_p7 }
 0x5ab   :  { %761 = shalt.err (!%p758_p9)
}
 0x5ac   :  { %620 = dma.vmem_to_hbm [thread:$0]  %s618_s19, 16, %s938_s3, [#allocation5]  }
 0x5ad   :  { %766 = dma.done.wait [#allocation5], 16  }
 0x5ae   :  { %767 = vsyncadd [#allocation5], 4294967280 }
 0x5af   :  { %624 = vsyncpa [#allocation4], 1 }
 0x5b0   :  { %625 = vsyncpa [#allocation7], 1 }
 0x5b1   :  { %626 = vsyncpa [#allocation5], 1 }

</bundles_post_ra>
